<compile_context>
chip_gen: v7x
topology: tpu7x:2x2x1
jax: 0.10.0
libtpu: 0.0.40
codegen_flags: <defaults>
</compile_context>

<pallas_src>
import jax
import jax.numpy as jnp
import numpy as np
from jax.experimental import pallas as pl
from jax.experimental.pallas import tpu as pltpu

EPS = 1e-5  # nn.BatchNorm2d default


def _round_up(x, m):
    return (x + m - 1) // m * m


def _tap_groups(stride):
    """Group the 9 depthwise taps by (phase, row-offset): each group shares one
    row-window load; members differ only in the (static) column offset."""
    groups = {}
    for k in range(9):
        kh, kw = divmod(k, 3)
        ph = (kh % stride) * stride + (kw % stride)
        r0, c0 = kh // stride, kw // stride
        groups.setdefault((ph, r0), []).append((k, c0))
    return groups


def _pick_tiles(N, Ho, Wo_pad, P, Hpp, Wpp, Cin, Cop, mm_bytes,
                target_m=1024, vmem_cap=48 * 1024 * 1024):
    """Choose (NB, HB) so NB*HB*Wo_pad rows feed the MXU per step while the
    double-buffered working set stays comfortably inside v7x's 64 MiB VMEM."""
    div_h = [h for h in range(1, Ho + 1) if Ho % h == 0]
    HB = max([h for h in div_h if h * Wo_pad <= target_m], default=1)
    div_n = [n for n in range(1, N + 1) if N % n == 0]
    # keep >=2 batch grid steps when possible so v7x shards batch across cores
    cand = [n for n in div_n
            if n * HB * Wo_pad <= target_m and (n == 1 or N // n >= 2)]
    NB = max(cand, default=1)

    def est(nb, hb):
        x_blk = nb * P * Hpp * Wpp * Cin * 4
        w_blk = (9 * Cin + Cin + Cop) * 4 + Cin * Cop * mm_bytes
        o_blk = nb * hb * Wo_pad * Cop * 4
        tmp = nb * hb * Wo_pad * (3 * Cin + Cop) * 4      # acc/y/taps + matmul out
        return 2 * (x_blk + w_blk + o_blk) + tmp          # x2: double-buffered blocks

    while est(NB, HB) > vmem_cap and NB > 1:
        NB = max(n for n in div_n if n < NB)
    while est(NB, HB) > vmem_cap and HB > 1:
        HB = max(h for h in div_h if h < HB)
    return NB, HB, est(NB, HB)


def _make_kernel(stride, NB, HB, Wo_pad, Cin, Cop, matmul_dtype):
    groups = _tap_groups(stride)

    def kernel(x_ref, wdw_ref, b1_ref, wpw_ref, b2_ref, o_ref):
        # x_ref : (NB, P, Hpp, Wpp, Cin) phase-decomposed padded images; its block
        #         index only depends on the batch axis, so it stays VMEM-resident
        #         across all row tiles of the same images.
        # o_ref : (NB, HB*Wo_pad, Cop) flattened, lane-dense output rows.
        t = pl.program_id(1)
        row0 = pl.multiple_of(t * HB, HB)

        w_dw = wdw_ref[...]                  # (9, Cin), BN1 scale pre-folded
        b1 = b1_ref[...]                     # (1, Cin)

        acc = None
        for (ph, r0), taps in groups.items():
            # one aligned load per distinct row window (3 for s=1, 6 for s=2)
            win = x_ref[:, ph, pl.ds(row0 + r0, HB), :, :].astype(jnp.float32)
            for k, c0 in taps:
                tap = win[:, :, c0:c0 + Wo_pad, :]      # static column-offset slice
                contrib = tap * w_dw[k]
                if acc is None:
                    acc = contrib + b1                   # BN1 bias folded into init
                else:
                    acc = acc + contrib

        y = jnp.maximum(acc, 0.0)                        # ReLU, (NB, HB, Wo_pad, Cin)

        # Pointwise 1x1 conv on the MXU (bf16 operands, f32 accumulation).
        y2 = y.reshape(NB * HB * Wo_pad, Cin).astype(matmul_dtype)
        z = jnp.dot(y2, wpw_ref[...], preferred_element_type=jnp.float32)

        # BN2 bias + ReLU (scale folded into wpw); lane-dense store (Cop % 128 == 0).
        z = jnp.maximum(z + b2_ref[...], 0.0)
        o_ref[...] = z.reshape(NB, HB * Wo_pad, Cop).astype(o_ref.dtype)

    return kernel


def conv_bn_relu_dw_nhwc(x_nhwc, w_dw, gamma1, beta1, mean1, var1,
                         w_pw, gamma2, beta2, mean2, var2, stride,
                         matmul_dtype=jnp.bfloat16):
    """Forward pass (eval-mode BN), NHWC in / NHWC out."""
    assert stride in (1, 2), "MobileNetV1 uses stride 1 or 2"
    N, H, W, Cin = x_nhwc.shape
    Cout = w_pw.shape[0]
    s = stride
    Ho = (H + 2 - 3) // s + 1
    Wo = (W + 2 - 3) // s + 1
    P = s * s
    E = 2 // s                              # halo rows/cols inside each phase
    Wo_pad = _round_up(Wo, 8)               # keep flattening layout-preserving
    Hpp, Wpp = Ho + E, Wo_pad + E

    # ---- glue: zero-pad, phase-decompose (same total bytes; skip stack if s==1) --
    x = x_nhwc.astype(jnp.float32)
    pad_h = s * Hpp - (H + 2)
    pad_w = s * Wpp - (W + 2)
    xp = jnp.pad(x, ((0, 0), (1, 1 + pad_h), (1, 1 + pad_w), (0, 0)))
    if s == 1:
        x_ph = xp[:, None]                  # (N, 1, Hpp, Wpp, Cin)
    else:
        x_ph = jnp.stack([xp[:, a::s, b::s, :] for a in range(s) for b in range(s)],
                         axis=1)            # (N, P, Hpp, Wpp, Cin)

    # ---- glue: fold eval-mode BN into weights (scale) + bias ----
    s1 = gamma1 / jnp.sqrt(var1 + EPS)
    b1v = (beta1 - mean1 * s1).reshape(1, Cin).astype(jnp.float32)
    s2 = gamma2 / jnp.sqrt(var2 + EPS)
    b2v = beta2 - mean2 * s2

    wdw = (jnp.transpose(w_dw[:, 0], (1, 2, 0)).reshape(9, Cin)
           * s1[None, :]).astype(jnp.float32)                       # (9, Cin)
    wpw = jnp.transpose(w_pw[:, :, 0, 0], (1, 0)) * s2[None, :]     # (Cin, Cout)

    # Pad Cout to a multiple of 128 -> unmasked lane-dense stores, aligned MXU N.
    Cop = _round_up(Cout, 128)
    wpw = jnp.pad(wpw, ((0, 0), (0, Cop - Cout))).astype(matmul_dtype)
    b2p = jnp.pad(b2v, (0, Cop - Cout)).reshape(1, Cop).astype(jnp.float32)

    mm_bytes = jnp.dtype(matmul_dtype).itemsize
    NB, HB, est = _pick_tiles(N, Ho, Wo_pad, P, Hpp, Wpp, Cin, Cop, mm_bytes)
    T = Ho // HB
    # vmem limit from actual block sizes, capped at v7x's 64 MiB physical VMEM
    vmem_limit = int(min(64 << 20, max(32 << 20, 3 * est // 2)))

    kernel = _make_kernel(s, NB, HB, Wo_pad, Cin, Cop, matmul_dtype)

    out_flat = pl.pallas_call(
        kernel,
        out_shape=jax.ShapeDtypeStruct((N, Ho * Wo_pad, Cop), x_nhwc.dtype),
        grid_spec=pltpu.PrefetchScalarGridSpec(
            num_scalar_prefetch=0,
            grid=(N // NB, T),                      # batch blocks x output-row tiles
            in_specs=[
                # whole per-image phase block; constant in t -> fetched once per n
                pl.BlockSpec((NB, P, Hpp, Wpp, Cin), lambda n, t: (n, 0, 0, 0, 0)),
                pl.BlockSpec((9, Cin), lambda n, t: (0, 0)),
                pl.BlockSpec((1, Cin), lambda n, t: (0, 0)),
                pl.BlockSpec((Cin, Cop), lambda n, t: (0, 0)),
                pl.BlockSpec((1, Cop), lambda n, t: (0, 0)),
            ],
            out_specs=pl.BlockSpec((NB, HB * Wo_pad, Cop), lambda n, t: (n, t, 0)),
        ),
        compiler_params=pltpu.CompilerParams(
            # batch "parallel" so v7x cores split over images (not over row tiles,
            # which would duplicate the per-image input DMA on both cores).
            dimension_semantics=("parallel", "arbitrary"),
            vmem_limit_bytes=vmem_limit,
        ),
    )(x_ph, wdw, b1v, wpw, b2p)

    out = out_flat.reshape(N, Ho, Wo_pad, Cop)[:, :, :Wo, :Cout]
    return out                                        # (N, Ho, Wo, Cout) NHWC


def conv_bn_relu_dw(x_nchw, w_dw, gamma1, beta1, mean1, var1,
                    w_pw, gamma2, beta2, mean2, var2, stride,
                    matmul_dtype=jnp.bfloat16):
    """NCHW wrapper matching the PyTorch module interface."""
    x_nhwc = jnp.transpose(x_nchw, (0, 2, 3, 1))
    out = conv_bn_relu_dw_nhwc(x_nhwc, w_dw, gamma1, beta1, mean1, var1,
                               w_pw, gamma2, beta2, mean2, var2, stride,
                               matmul_dtype=matmul_dtype)
    return jnp.transpose(out, (0, 3, 1, 2))


def reference(x_nchw, w_dw, gamma1, beta1, mean1, var1,
              w_pw, gamma2, beta2, mean2, var2, stride):
    """Pure-JAX (XLA conv) reference, same semantics (eval-mode BN)."""
    Cin = x_nchw.shape[1]
    y = jax.lax.conv_general_dilated(
        x_nchw, w_dw, window_strides=(stride, stride),
        padding=((1, 1), (1, 1)), feature_group_count=Cin,
        dimension_numbers=("NCHW", "OIHW", "NCHW"))
    y = (y - mean1[None, :, None, None]) \
        * (gamma1 / jnp.sqrt(var1 + EPS))[None, :, None, None] \
        + beta1[None, :, None, None]
    y = jnp.maximum(y, 0.0)
    z = jax.lax.conv_general_dilated(
        y, w_pw, window_strides=(1, 1), padding=((0, 0), (0, 0)),
        dimension_numbers=("NCHW", "OIHW", "NCHW"))
    z = (z - mean2[None, :, None, None]) \
        * (gamma2 / jnp.sqrt(var2 + EPS))[None, :, None, None] \
        + beta2[None, :, None, None]
    return jnp.maximum(z, 0.0)


if __name__ == "__main__":
    N, Cin, H, W, Cout = 2, 4, 16, 16, 8

    key = jax.random.PRNGKey(0)
    ks = jax.random.split(key, 11)
    x = jax.random.normal(ks[0], (N, Cin, H, W), jnp.float32)
    w_dw = 0.2 * jax.random.normal(ks[1], (Cin, 1, 3, 3), jnp.float32)    # depthwise (OIHW, groups=Cin)
    gamma1 = 1.0 + 0.1 * jax.random.normal(ks[2], (Cin,), jnp.float32)
    beta1 = 0.1 * jax.random.normal(ks[3], (Cin,), jnp.float32)
    mean1 = 0.1 * jax.random.normal(ks[4], (Cin,), jnp.float32)
    var1 = 1.0 + 0.1 * jax.random.uniform(ks[5], (Cin,), jnp.float32)
    w_pw = 0.2 * jax.random.normal(ks[6], (Cout, Cin, 1, 1), jnp.float32)  # pointwise
    gamma2 = 1.0 + 0.1 * jax.random.normal(ks[7], (Cout,), jnp.float32)
    beta2 = 0.1 * jax.random.normal(ks[8], (Cout,), jnp.float32)
    mean2 = 0.1 * jax.random.normal(ks[9], (Cout,), jnp.float32)
    var2 = 1.0 + 0.1 * jax.random.uniform(ks[10], (Cout,), jnp.float32)

    for stride in (2, 1):
        ref = reference(x, w_dw, gamma1, beta1, mean1, var1,
                        w_pw, gamma2, beta2, mean2, var2, stride)
        Ho = (H + 2 - 3) // stride + 1
        Wo = (W + 2 - 3) // stride + 1

        # Default fast path: bf16 MXU operands, f32 accumulation.
        out_bf = conv_bn_relu_dw(x, w_dw, gamma1, beta1, mean1, var1,
                                 w_pw, gamma2, beta2, mean2, var2, stride,
                                 matmul_dtype=jnp.bfloat16)
        out_bf = jax.block_until_ready(out_bf)
        assert out_bf.shape == ref.shape == (N, Cout, Ho, Wo), out_bf.shape
        np.testing.assert_allclose(np.asarray(out_bf), np.asarray(ref),
                                   atol=5e-2, rtol=5e-2)

        # Exact-match path: f32 MXU, validated at tight tolerance.
        out_f32 = conv_bn_relu_dw(x, w_dw, gamma1, beta1, mean1, var1,
                                  w_pw, gamma2, beta2, mean2, var2, stride,
                                  matmul_dtype=jnp.float32)
        out_f32 = jax.block_until_ready(out_f32)
        np.testing.assert_allclose(np.asarray(out_f32), np.asarray(ref),
                                   atol=1e-4, rtol=1e-4)

    print("KERNEL_OK")
</pallas_src>

<mosaic_0001>
module attributes {stable_mosaic.version = 11 : i64} {
  func.func @kernel(%arg0: i32, %arg1: i32, %arg2: memref<1x4x9x9x4xf32, #tpu.memory_space<vmem>>, %arg3: memref<9x4xf32, #tpu.memory_space<vmem>>, %arg4: memref<1x4xf32, #tpu.memory_space<vmem>>, %arg5: memref<4x128xbf16, #tpu.memory_space<vmem>>, %arg6: memref<1x128xf32, #tpu.memory_space<vmem>>, %arg7: memref<1x64x128xf32, #tpu.memory_space<vmem>>) attributes {dimension_semantics = [#tpu.dimension_semantics<parallel>, #tpu.dimension_semantics<arbitrary>], iteration_bounds = array<i64: 2, 1>, scalar_prefetch = 0 : i64, scratch_operands = 0 : i64, tpu.core_type = #tpu.core_type<tc>, window_params = [{transform_indices = @transform_0, window_bounds = array<i64: 1, 4, 9, 9, 4>}, {pipeline_mode = #tpu.pipeline_mode<synchronous>, transform_indices = @transform_1, window_bounds = array<i64: 9, 4>}, {pipeline_mode = #tpu.pipeline_mode<synchronous>, transform_indices = @transform_2, window_bounds = array<i64: 1, 4>}, {pipeline_mode = #tpu.pipeline_mode<synchronous>, transform_indices = @transform_3, window_bounds = array<i64: 4, 128>}, {pipeline_mode = #tpu.pipeline_mode<synchronous>, transform_indices = @transform_4, window_bounds = array<i64: 1, 128>}, {transform_indices = @transform_5, window_bounds = array<i64: 1, 64, 128>}]} {
    %c8_i32 = arith.constant 8 : i32
    %0 = arith.muli %arg1, %c8_i32 : i32
    %1 = tpu.assume_multiple %0, 8 : i32
    %c0 = arith.constant 0 : index
    %c0_0 = arith.constant 0 : index
    %2 = vector.load %arg3[%c0, %c0_0] : memref<9x4xf32, #tpu.memory_space<vmem>>, vector<9x4xf32>
    %c0_1 = arith.constant 0 : index
    %c0_2 = arith.constant 0 : index
    %3 = vector.load %arg4[%c0_1, %c0_2] : memref<1x4xf32, #tpu.memory_space<vmem>>, vector<1x4xf32>
    %c0_i32 = arith.constant 0 : i32
    %4 = arith.addi %1, %c0_i32 : i32
    %c0_3 = arith.constant 0 : index
    %c0_4 = arith.constant 0 : index
    %5 = arith.index_cast %4 : i32 to index
    %c0_5 = arith.constant 0 : index
    %c0_6 = arith.constant 0 : index
    %6 = vector.load %arg2[%c0_3, %c0_4, %5, %c0_5, %c0_6] : memref<1x4x9x9x4xf32, #tpu.memory_space<vmem>>, vector<1x1x8x9x4xf32>
    %7 = vector.shape_cast %6 : vector<1x1x8x9x4xf32> to vector<1x8x9x4xf32>
    %8 = vector.extract_strided_slice %7 {offsets = [0, 0, 0, 0], sizes = [1, 8, 8, 4], strides = [1, 1, 1, 1]} : vector<1x8x9x4xf32> to vector<1x8x8x4xf32>
    %9 = vector.extract_strided_slice %2 {offsets = [0, 0], sizes = [1, 4], strides = [1, 1]} : vector<9x4xf32> to vector<1x4xf32>
    %10 = vector.shape_cast %9 : vector<1x4xf32> to vector<4xf32>
    %11 = vector.shape_cast %10 : vector<4xf32> to vector<1x1x1x4xf32>
    %12 = vector.broadcast %11 : vector<1x1x1x4xf32> to vector<1x8x8x4xf32>
    %13 = arith.mulf %8, %12 : vector<1x8x8x4xf32>
    %14 = vector.shape_cast %3 : vector<1x4xf32> to vector<1x1x1x4xf32>
    %15 = vector.broadcast %14 : vector<1x1x1x4xf32> to vector<1x8x8x4xf32>
    %16 = arith.addf %13, %15 : vector<1x8x8x4xf32>
    %17 = vector.extract_strided_slice %7 {offsets = [0, 0, 1, 0], sizes = [1, 8, 8, 4], strides = [1, 1, 1, 1]} : vector<1x8x9x4xf32> to vector<1x8x8x4xf32>
    %18 = vector.extract_strided_slice %2 {offsets = [2, 0], sizes = [1, 4], strides = [1, 1]} : vector<9x4xf32> to vector<1x4xf32>
    %19 = vector.shape_cast %18 : vector<1x4xf32> to vector<4xf32>
    %20 = vector.shape_cast %19 : vector<4xf32> to vector<1x1x1x4xf32>
    %21 = vector.broadcast %20 : vector<1x1x1x4xf32> to vector<1x8x8x4xf32>
    %22 = arith.mulf %17, %21 : vector<1x8x8x4xf32>
    %23 = arith.addf %16, %22 : vector<1x8x8x4xf32>
    %c0_i32_7 = arith.constant 0 : i32
    %24 = arith.addi %1, %c0_i32_7 : i32
    %c0_8 = arith.constant 0 : index
    %c1 = arith.constant 1 : index
    %25 = arith.index_cast %24 : i32 to index
    %c0_9 = arith.constant 0 : index
    %c0_10 = arith.constant 0 : index
    %26 = vector.load %arg2[%c0_8, %c1, %25, %c0_9, %c0_10] : memref<1x4x9x9x4xf32, #tpu.memory_space<vmem>>, vector<1x1x8x9x4xf32>
    %27 = vector.shape_cast %26 : vector<1x1x8x9x4xf32> to vector<1x8x9x4xf32>
    %28 = vector.extract_strided_slice %27 {offsets = [0, 0, 0, 0], sizes = [1, 8, 8, 4], strides = [1, 1, 1, 1]} : vector<1x8x9x4xf32> to vector<1x8x8x4xf32>
    %29 = vector.extract_strided_slice %2 {offsets = [1, 0], sizes = [1, 4], strides = [1, 1]} : vector<9x4xf32> to vector<1x4xf32>
    %30 = vector.shape_cast %29 : vector<1x4xf32> to vector<4xf32>
    %31 = vector.shape_cast %30 : vector<4xf32> to vector<1x1x1x4xf32>
    %32 = vector.broadcast %31 : vector<1x1x1x4xf32> to vector<1x8x8x4xf32>
    %33 = arith.mulf %28, %32 : vector<1x8x8x4xf32>
    %34 = arith.addf %23, %33 : vector<1x8x8x4xf32>
    %c0_i32_11 = arith.constant 0 : i32
    %35 = arith.addi %1, %c0_i32_11 : i32
    %c0_12 = arith.constant 0 : index
    %c2 = arith.constant 2 : index
    %36 = arith.index_cast %35 : i32 to index
    %c0_13 = arith.constant 0 : index
    %c0_14 = arith.constant 0 : index
    %37 = vector.load %arg2[%c0_12, %c2, %36, %c0_13, %c0_14] : memref<1x4x9x9x4xf32, #tpu.memory_space<vmem>>, vector<1x1x8x9x4xf32>
    %38 = vector.shape_cast %37 : vector<1x1x8x9x4xf32> to vector<1x8x9x4xf32>
    %39 = vector.extract_strided_slice %38 {offsets = [0, 0, 0, 0], sizes = [1, 8, 8, 4], strides = [1, 1, 1, 1]} : vector<1x8x9x4xf32> to vector<1x8x8x4xf32>
    %40 = vector.extract_strided_slice %2 {offsets = [3, 0], sizes = [1, 4], strides = [1, 1]} : vector<9x4xf32> to vector<1x4xf32>
    %41 = vector.shape_cast %40 : vector<1x4xf32> to vector<4xf32>
    %42 = vector.shape_cast %41 : vector<4xf32> to vector<1x1x1x4xf32>
    %43 = vector.broadcast %42 : vector<1x1x1x4xf32> to vector<1x8x8x4xf32>
    %44 = arith.mulf %39, %43 : vector<1x8x8x4xf32>
    %45 = arith.addf %34, %44 : vector<1x8x8x4xf32>
    %46 = vector.extract_strided_slice %38 {offsets = [0, 0, 1, 0], sizes = [1, 8, 8, 4], strides = [1, 1, 1, 1]} : vector<1x8x9x4xf32> to vector<1x8x8x4xf32>
    %47 = vector.extract_strided_slice %2 {offsets = [5, 0], sizes = [1, 4], strides = [1, 1]} : vector<9x4xf32> to vector<1x4xf32>
    %48 = vector.shape_cast %47 : vector<1x4xf32> to vector<4xf32>
    %49 = vector.shape_cast %48 : vector<4xf32> to vector<1x1x1x4xf32>
    %50 = vector.broadcast %49 : vector<1x1x1x4xf32> to vector<1x8x8x4xf32>
    %51 = arith.mulf %46, %50 : vector<1x8x8x4xf32>
    %52 = arith.addf %45, %51 : vector<1x8x8x4xf32>
    %c0_i32_15 = arith.constant 0 : i32
    %53 = arith.addi %1, %c0_i32_15 : i32
    %c0_16 = arith.constant 0 : index
    %c3 = arith.constant 3 : index
    %54 = arith.index_cast %53 : i32 to index
    %c0_17 = arith.constant 0 : index
    %c0_18 = arith.constant 0 : index
    %55 = vector.load %arg2[%c0_16, %c3, %54, %c0_17, %c0_18] : memref<1x4x9x9x4xf32, #tpu.memory_space<vmem>>, vector<1x1x8x9x4xf32>
    %56 = vector.shape_cast %55 : vector<1x1x8x9x4xf32> to vector<1x8x9x4xf32>
    %57 = vector.extract_strided_slice %56 {offsets = [0, 0, 0, 0], sizes = [1, 8, 8, 4], strides = [1, 1, 1, 1]} : vector<1x8x9x4xf32> to vector<1x8x8x4xf32>
    %58 = vector.extract_strided_slice %2 {offsets = [4, 0], sizes = [1, 4], strides = [1, 1]} : vector<9x4xf32> to vector<1x4xf32>
    %59 = vector.shape_cast %58 : vector<1x4xf32> to vector<4xf32>
    %60 = vector.shape_cast %59 : vector<4xf32> to vector<1x1x1x4xf32>
    %61 = vector.broadcast %60 : vector<1x1x1x4xf32> to vector<1x8x8x4xf32>
    %62 = arith.mulf %57, %61 : vector<1x8x8x4xf32>
    %63 = arith.addf %52, %62 : vector<1x8x8x4xf32>
    %c1_i32 = arith.constant 1 : i32
    %64 = arith.addi %1, %c1_i32 : i32
    %c0_19 = arith.constant 0 : index
    %c0_20 = arith.constant 0 : index
    %65 = arith.index_cast %64 : i32 to index
    %c0_21 = arith.constant 0 : index
    %c0_22 = arith.constant 0 : index
    %66 = vector.load %arg2[%c0_19, %c0_20, %65, %c0_21, %c0_22] : memref<1x4x9x9x4xf32, #tpu.memory_space<vmem>>, vector<1x1x8x9x4xf32>
    %67 = vector.shape_cast %66 : vector<1x1x8x9x4xf32> to vector<1x8x9x4xf32>
    %68 = vector.extract_strided_slice %67 {offsets = [0, 0, 0, 0], sizes = [1, 8, 8, 4], strides = [1, 1, 1, 1]} : vector<1x8x9x4xf32> to vector<1x8x8x4xf32>
    %69 = vector.extract_strided_slice %2 {offsets = [6, 0], sizes = [1, 4], strides = [1, 1]} : vector<9x4xf32> to vector<1x4xf32>
    %70 = vector.shape_cast %69 : vector<1x4xf32> to vector<4xf32>
    %71 = vector.shape_cast %70 : vector<4xf32> to vector<1x1x1x4xf32>
    %72 = vector.broadcast %71 : vector<1x1x1x4xf32> to vector<1x8x8x4xf32>
    %73 = arith.mulf %68, %72 : vector<1x8x8x4xf32>
    %74 = arith.addf %63, %73 : vector<1x8x8x4xf32>
    %75 = vector.extract_strided_slice %67 {offsets = [0, 0, 1, 0], sizes = [1, 8, 8, 4], strides = [1, 1, 1, 1]} : vector<1x8x9x4xf32> to vector<1x8x8x4xf32>
    %76 = vector.extract_strided_slice %2 {offsets = [8, 0], sizes = [1, 4], strides = [1, 1]} : vector<9x4xf32> to vector<1x4xf32>
    %77 = vector.shape_cast %76 : vector<1x4xf32> to vector<4xf32>
    %78 = vector.shape_cast %77 : vector<4xf32> to vector<1x1x1x4xf32>
    %79 = vector.broadcast %78 : vector<1x1x1x4xf32> to vector<1x8x8x4xf32>
    %80 = arith.mulf %75, %79 : vector<1x8x8x4xf32>
    %81 = arith.addf %74, %80 : vector<1x8x8x4xf32>
    %c1_i32_23 = arith.constant 1 : i32
    %82 = arith.addi %1, %c1_i32_23 : i32
    %c0_24 = arith.constant 0 : index
    %c1_25 = arith.constant 1 : index
    %83 = arith.index_cast %82 : i32 to index
    %c0_26 = arith.constant 0 : index
    %c0_27 = arith.constant 0 : index
    %84 = vector.load %arg2[%c0_24, %c1_25, %83, %c0_26, %c0_27] : memref<1x4x9x9x4xf32, #tpu.memory_space<vmem>>, vector<1x1x8x9x4xf32>
    %85 = vector.shape_cast %84 : vector<1x1x8x9x4xf32> to vector<1x8x9x4xf32>
    %86 = vector.extract_strided_slice %85 {offsets = [0, 0, 0, 0], sizes = [1, 8, 8, 4], strides = [1, 1, 1, 1]} : vector<1x8x9x4xf32> to vector<1x8x8x4xf32>
    %87 = vector.extract_strided_slice %2 {offsets = [7, 0], sizes = [1, 4], strides = [1, 1]} : vector<9x4xf32> to vector<1x4xf32>
    %88 = vector.shape_cast %87 : vector<1x4xf32> to vector<4xf32>
    %89 = vector.shape_cast %88 : vector<4xf32> to vector<1x1x1x4xf32>
    %90 = vector.broadcast %89 : vector<1x1x1x4xf32> to vector<1x8x8x4xf32>
    %91 = arith.mulf %86, %90 : vector<1x8x8x4xf32>
    %92 = arith.addf %81, %91 : vector<1x8x8x4xf32>
    %cst = arith.constant 0.000000e+00 : f32
    %93 = vector.broadcast %cst : f32 to vector<1x8x8x4xf32>
    %94 = arith.maximumf %92, %93 : vector<1x8x8x4xf32>
    %95 = vector.shape_cast %94 : vector<1x8x8x4xf32> to vector<64x4xf32>
    %96 = arith.truncf %95 : vector<64x4xf32> to vector<64x4xbf16>
    %c0_28 = arith.constant 0 : index
    %c0_29 = arith.constant 0 : index
    %97 = vector.load %arg5[%c0_28, %c0_29] : memref<4x128xbf16, #tpu.memory_space<vmem>>, vector<4x128xbf16>
    %cst_30 = arith.constant dense<0.000000e+00> : vector<64x128xf32>
    %98 = tpu.matmul %96, %97, %cst_30 {dimension_numbers = #tpu.dot_dimension_numbers<[1], [0], [0], [1], [0, 0, 1, 1], [], []>} : vector<64x4xbf16>, vector<4x128xbf16>, vector<64x128xf32> -> vector<64x128xf32>
    %c0_31 = arith.constant 0 : index
    %c0_32 = arith.constant 0 : index
    %99 = vector.load %arg6[%c0_31, %c0_32] : memref<1x128xf32, #tpu.memory_space<vmem>>, vector<1x128xf32>
    %100 = vector.broadcast %99 : vector<1x128xf32> to vector<64x128xf32>
    %101 = arith.addf %98, %100 : vector<64x128xf32>
    %cst_33 = arith.constant 0.000000e+00 : f32
    %102 = vector.broadcast %cst_33 : f32 to vector<64x128xf32>
    %103 = arith.maximumf %101, %102 : vector<64x128xf32>
    %104 = vector.shape_cast %103 : vector<64x128xf32> to vector<1x64x128xf32>
    %c0_34 = arith.constant 0 : index
    %c0_35 = arith.constant 0 : index
    %c0_36 = arith.constant 0 : index
    %105 = vector.load %arg7[%c0_34, %c0_35, %c0_36] : memref<1x64x128xf32, #tpu.memory_space<vmem>>, vector<1x64x128xf32>
    tpu.vector_store %arg7[%c0_34, %c0_35, %c0_36], %104 {strides = array<i32>} : memref<1x64x128xf32, #tpu.memory_space<vmem>>, vector<1x64x128xf32>,
    return
  }
  func.func @transform_0(%arg0: i32, %arg1: i32) -> (i32, i32, i32, i32, i32) {
    %c0_i32 = arith.constant 0 : i32
    %c0_i32_0 = arith.constant 0 : i32
    %c0_i32_1 = arith.constant 0 : i32
    %c0_i32_2 = arith.constant 0 : i32
    %c0_i32_3 = arith.constant 0 : i32
    return %arg0, %c0_i32, %c0_i32_0, %c0_i32_1, %c0_i32_2 : i32, i32, i32, i32, i32
  }
  func.func @transform_1(%arg0: i32, %arg1: i32) -> (i32, i32) {
    %c0_i32 = arith.constant 0 : i32
    %c0_i32_0 = arith.constant 0 : i32
    %c0_i32_1 = arith.constant 0 : i32
    return %c0_i32, %c0_i32_0 : i32, i32
  }
  func.func @transform_2(%arg0: i32, %arg1: i32) -> (i32, i32) {
    %c0_i32 = arith.constant 0 : i32
    %c0_i32_0 = arith.constant 0 : i32
    %c0_i32_1 = arith.constant 0 : i32
    return %c0_i32, %c0_i32_0 : i32, i32
  }
  func.func @transform_3(%arg0: i32, %arg1: i32) -> (i32, i32) {
    %c0_i32 = arith.constant 0 : i32
    %c0_i32_0 = arith.constant 0 : i32
    %c0_i32_1 = arith.constant 0 : i32
    return %c0_i32, %c0_i32_0 : i32, i32
  }
  func.func @transform_4(%arg0: i32, %arg1: i32) -> (i32, i32) {
    %c0_i32 = arith.constant 0 : i32
    %c0_i32_0 = arith.constant 0 : i32
    %c0_i32_1 = arith.constant 0 : i32
    return %c0_i32, %c0_i32_0 : i32, i32
  }
  func.func @transform_5(%arg0: i32, %arg1: i32) -> (i32, i32, i32) {
    %c0_i32 = arith.constant 0 : i32
    %c0_i32_0 = arith.constant 0 : i32
    return %arg0, %arg1, %c0_i32 : i32, i32, i32
  }
}

</mosaic_0001>

<bundles_post_ra>
// kernel: tpu_custom_call.1
= control target key start
LH: loop header
LB: loop body
LE: loop exit
PB: predicated region body
PF: predicated region fallthrough
CT: control target
= control target key end

     0   :  { %10 = vsyncpa [#allocation3], 0  ;;  %s1577_s0 = inlined_call_operand.vmem [shape: f32[2,4,9,9,4], index: 0, kind: input, shape index: {}]   ;;  %s1578_s1 = inlined_call_operand.vmem [shape: f32[9,4], index: 1, kind: input, shape index: {}]   ;;  %s1579_s2 = inlined_call_operand.vmem [shape: f32[1,4], index: 2, kind: input, shape index: {}]   ;;  %s1580_s3 = inlined_call_operand.vmem [shape: bf16[4,128], index: 3, kind: input, shape index: {}]   ;;  %s1581_s4 = inlined_call_operand.vmem [shape: f32[1,128], index: 4, kind: input, shape index: {}]   ;;  %s1582_s5 = inlined_call_operand.hbm [shape: f32[2,64,128], index: 5, kind: output, shape index: {}]  }
   0x1   :  { %12 = vsyncpa [#allocation3 + $0x1], 0  ;;  %s1175_s18 = smov 0   ;;  %s1177_s19 = smov 0  }
   0x2   :  { %s1179_s20 = smov 0   ;;  %s1181_s21 = smov 0  }
   0x3   :  { %s1183_s22 = smov 0   ;;  %s1185_s23 = smov 0  }
   0x4 LB: > { %s909_s24 = sadd.s32 4294967295, %s1140_s23   ;;  %s910_s25 = sadd.s32 4294967294, %s1140_s23   ;;  %s1140_s23 = sphi %s1185_s23, %s18_s23   ;;  %s1136_s22 = sphi %s1183_s22, %s1589_s22   ;;  %s1132_s21 = sphi %s1181_s21, %s1588_s21   ;;  %s1128_s20 = sphi %s1179_s20, %s1587_s20   ;;  %s1124_s19 = sphi %s1177_s19, %s1586_s19   ;;  %s1120_s18 = sphi %s1175_s18, %s1585_s18  }
   0x5   : > { %s30_s26 = sadd.s32 1, %s1136_s22  ;;  %s149_s27 = sadd.s32 1, %s1128_s20 }
   0x6   : > { %p32_p0 = scmp.ge.s32.totalorder %s30_s26, 2  ;;  %p159_p1 = scmp.ne.s32.totalorder %s1128_s20, %s1124_s19 }
   0x7   : > { %p160_p2 = scmp.eq.s32.totalorder %s909_s24, 1  ;;  %p165_p3 = scmp.ne.s32.totalorder %s1124_s19, %s1120_s18 }
   0x8   : > { %s1591_s26 = smov (%p32_p0, %s30_s26), 0  ;;  %p166_p5 = scmp.eq.s32.totalorder %s910_s25, 1 }
   0x9   : > { %p1215_p4 = por %p160_p2, %p159_p1  ;;  %s144_s29 = ssub.s32 %s1136_s22, %s1591_s26 }
   0xa   : > { %p913_p6 = scmp.ge.s32.totalorder %s1140_s23, 1  ;;  %p147_p7 = scmp.eq.s32.totalorder %s144_s29, 0 }
   0xb   : > { %p1222_p8 = por %p166_p5, %p165_p3  ;;  %p204_p9 = scmp.lt.s32.totalorder %s1140_s23, 3 }
   0xc   : > { %s1228_s6 = scalar_select %p147_p7, %s1128_s20, %s149_s27  }
   0xd   : > { %p205_p10 = pnand %p913_p6, %p204_p9 }
   0xe   : > { %v695_v0 = vld [vmem:[%s1580_s3] sm:$0x3] (!%p205_p10)  ;;  %vm716_vm0 = vcmask (!%p205_p10), 1041408   ;;  %p232_p11 = scmp.lt.s32.totalorder (!%p205_p10), %s1132_s21, 1  ;;  %v261_v1 = vlaneseq (!%p205_p10)  ;;  %vm323_vm1 = vcmask (!%p205_p10), 1046528   ;;  %vm703_vm2 = vcmask (!%p205_p10), 31744  }
   0xf   : > { %208 = sbr.rel (%p205_p10) target bundleno = 334 (0x14e), region = 40  ;;  %1002 = vmatprep.subr.msk.bf16.mxu0 (!%p205_p10), %vm716_vm0, %v695_v0  ;;  %1003 = vmatprep.subr.msk.bf16.mxu1 (!%p205_p10), %vm716_vm0, %v695_v0  ;;  %v718_v2 = vsel (!%p205_p10), %vm716_vm0, %v695_v0, 0  ;;  %v240_v4 = vld [vmem:[%s1578_s1] sm:$0xff] (!%p205_p10)  ;;  %v1295_v54 = vld [vmem:[%s1578_s1 + $0x8] ss:$0 sm:$0xff] (!%p205_p10)  ;;  %s229_s27 = sand.u32 (!%p205_p10), 1, %s1124_s19  }
  0x10   : > { %991 = vmatpush3.bf16.msra.mxu0 (!%p205_p10), %v718_v2  ;;  %1001 = vmatpush3.bf16.msra.mxu1 (!%p205_p10), %v718_v2  ;;  %v262_v3 = vshrl.u32 (!%p205_p10), %v261_v1, 7  ;;  %v1246_v13 = vld [vmem:[%s1579_s2] ss:$0 sm:$0xff] (!%p205_p10)  ;;  %s914_s8 = sshll.u32 (!%p205_p10), %s229_s27, 6  ;;  %s984_s10 = sshll.u32 (!%p205_p10), %s1132_s21, 10 }
  0x11   : > { %s1525_s14 = scalar_lea.hbm (!%p205_p10), %s1582_s5, %s984_s10  ;;  %s1142_s16 = smov (!%p205_p10), [#allocation2]  }
  0x12   : > { %v263_v5 = vsub.s32 (!%p205_p10), 0, %v262_v3  ;;  %v289_v6 = vsub.s32 (!%p205_p10), 2, %v262_v3  ;;  %v376_v7 = vsub.s32 (!%p205_p10), 1, %v262_v3  ;;  %v414_v8 = vsub.s32 (!%p205_p10), 3, %v262_v3  ;;  %s1066_s17 = sshll.u32 (!%p205_p10), %s1142_s16, 4  ;;  %s1067_s17 = int_to_ptr.vmem [resolvable:$false] %s1066_s17 }
  0x13   : > { %v434_v9 = vsub.s32 (!%p205_p10), 5, %v262_v3  ;;  %v520_v10 = vsub.s32 (!%p205_p10), 4, %v262_v3  ;;  %v559_v11 = vsub.s32 (!%p205_p10), 6, %v262_v3  ;;  %v665_v12 = vsub.s32 (!%p205_p10), 7, %v262_v3  ;;  %s1068_s24 = scalar_lea.vmem (!%p205_p10), %s1067_s17, 2048 }
  0x14   : > { %v1248_v14 = vrot.slane (!%p205_p10), %v240_v4, %v263_v5  ;;  %v1250_v15 = vrot.slane (!%p205_p10), %v240_v4, %v289_v6  ;;  %v1252_v16 = vrot.slane (!%p205_p10), %v240_v4, %v376_v7  ;;  %v1254_v17 = vrot.slane (!%p205_p10), %v240_v4, %v414_v8 }
  0x15   : > { %v1259_v21 = vrot.slane (!%p205_p10), %v240_v4, %v434_v9  ;;  %v1261_v22 = vrot.slane (!%p205_p10), %v240_v4, %v520_v10  ;;  %v1263_v23 = vrot.slane (!%p205_p10), %v240_v4, %v559_v11  ;;  %v1265_v24 = vrot.slane (!%p205_p10), %v240_v4, %v665_v12 }
  0x16   : > { %s233_s9 = scalar_select %p232_p11, %s1132_s21, 1 }
  0x17   : > { %s1531_s21 = scalar_lea.sflag [#allocation3], %s229_s27 }
  0x18   : > { %s1004_s12 = smul.u32 576, %s233_s9  ;;  %s231_s9 = scalar_lea.vmem [#allocation2], %s914_s8 }
  0x19   : > { %s817_s11 = sshll.u32 %s231_s9, 4  ;;  %s1527_s11 = int_to_ptr.vmem [resolvable:$true] %s817_s11 }
  0x1a   : > { %s1241_s15 = scalar_lea.vmem %s1577_s0, %s1004_s12  ;;  %p1069_p1 = scmp.lt.s32.totalorder %s1527_s11, %s1067_s17 }
  0x1b   : > { %v245_v18 = vld [vmem:[%s1241_s15] sm:$0xff]  ;;  %v246_v19 = vld [vmem:[%s1241_s15 + $0x8] sm:$0x1]  ;;  %v247_v20 = vld [vmem:[%s1241_s15 + $0x10] sm:$0xff] }
  0x1c   : > { %v248_v25 = vld [vmem:[%s1241_s15 + $0x18] sm:$0x1]  ;;  %v265_v26 = vmul.f32 %v1248_v14, %v245_v18  ;;  %v266_v27 = vmul.f32 %v1248_v14, %v247_v20  ;;  %v291_v28 = vmul.f32 %v1250_v15, %v245_v18  ;;  %v292_v29 = vmul.f32 %v1250_v15, %v246_v19  ;;  %v917_v30 = vld [vmem:[%s1241_s15 + $0x90] sm:$0xff]  ;;  %v918_v31 = vld [vmem:[%s1241_s15 + $0xa0] sm:$0xff] }
  0x1d   : > { %v293_v32 = vmul.f32 %v1250_v15, %v247_v20  ;;  %v294_v33 = vmul.f32 %v1250_v15, %v248_v25  ;;  %v378_v34 = vmul.f32 %v917_v30, %v1252_v16  ;;  %v379_v35 = vmul.f32 %v918_v31, %v1252_v16  ;;  %v925_v36 = vld [vmem:[%s1241_s15 + $0x120] sm:$0xff]  ;;  %v926_v37 = vld [vmem:[%s1241_s15 + $0x128] sm:$0x1]  ;;  %v927_v38 = vld [vmem:[%s1241_s15 + $0x130] sm:$0xff] }
  0x1e   : > { %v279_v39 = vadd.f32 %v1246_v13, %v265_v26  ;;  %v280_v40 = vadd.f32 %v1246_v13, %v266_v27  ;;  %v324_v41 = vrot.slane %v291_v28, 1  ;;  %v325_v42 = vrot.slane %v292_v29, 1  ;;  %v928_v43 = vld [vmem:[%s1241_s15 + $0x138] sm:$0x1]  ;;  %v941_v44 = vld [vmem:[%s1241_s15 + $0x1b0] sm:$0xff]  ;;  %v942_v53 = vld [vmem:[%s1241_s15 + $0x1c0] sm:$0xff] }
  0x1f   : > { %v327_v45 = vrot.slane %v293_v32, 1  ;;  %v328_v46 = vrot.slane %v294_v33, 1  ;;  %v416_v47 = vmul.f32 %v925_v36, %v1254_v17  ;;  %v417_v48 = vmul.f32 %v927_v38, %v1254_v17  ;;  %v950_v63 = vld [vmem:[%s1241_s15 + $0x18] sm:$0x1]  ;;  %v1303_v3 = vld [vmem:[%s1241_s15 + $0x20] sm:$0xff]  ;;  %v1319_v25 = vld [vmem:[%s1241_s15 + $0x50] sm:$0xff] }
  0x20   : > { %v326_v49 = vsel %vm323_vm1, %v324_v41, %v325_v42  ;;  %v436_v50 = vmul.f32 %v925_v36, %v1259_v21  ;;  %v437_v51 = vmul.f32 %v926_v37, %v1259_v21  ;;  %v438_v52 = vmul.f32 %v927_v38, %v1259_v21  ;;  %v952_v4 = vld [vmem:[%s1241_s15 + $0x28] sm:$0x1]  ;;  %v1316_v19 = vld [vmem:[%s1241_s15 + $0x40] sm:$0xff]  ;;  %v1323_v29 = vld [vmem:[%s1241_s15 + $0xb0] sm:$0xff] }
  0x21   : > { %v329_v55 = vsel %vm323_vm1, %v327_v45, %v328_v46  ;;  %v356_v56 = vadd.f32 %v326_v49, %v279_v39  ;;  %v439_v57 = vmul.f32 %v928_v43, %v1259_v21  ;;  %v522_v58 = vmul.f32 %v941_v44, %v1261_v22  ;;  %v254_v30 = vld [vmem:[%s1241_s15 + $0x48] sm:$0x1]  ;;  %v256_v38 = vld [vmem:[%s1241_s15 + $0x58] sm:$0x1]  ;;  %v1339_v44 = vld [vmem:[%s1241_s15 + $0xd0] sm:$0xff] }
  0x22   : > { %v357_v59 = vadd.f32 %v329_v55, %v280_v40  ;;  %v468_v60 = vrot.slane %v436_v50, 1  ;;  %v469_v61 = vrot.slane %v437_v51, 1  ;;  %v471_v62 = vrot.slane %v438_v52, 1  ;;  %v1342_v45 = vld [vmem:[%s1241_s15 + $0xe0] sm:$0xff] }
  0x23   : > { %v386_v0 = vadd.f32 %v378_v34, %v356_v56  ;;  %v472_v1 = vrot.slane %v439_v57, 1  ;;  %v523_v2 = vmul.f32 %v942_v53, %v1261_v22  ;;  %v561_v5 = vmul.f32 %v1263_v23, %v247_v20  ;;  %v933_v50 = vld [vmem:[%s1241_s15 + $0x160] sm:$0xff]  ;;  %v935_v56 = vld [vmem:[%s1241_s15 + $0x170] sm:$0xff] }
  0x24   : > { %v387_v6 = vadd.f32 %v379_v35, %v357_v59  ;;  %v470_v7 = vsel %vm323_vm1, %v468_v60, %v469_v61  ;;  %v562_v8 = vmul.f32 %v1303_v3, %v1263_v23  ;;  %v581_v9 = vmul.f32 %v1295_v54, %v247_v20  ;;  %v934_v61 = vld [vmem:[%s1241_s15 + $0x168] sm:$0x1] }
  0x25   : > { %v424_v10 = vadd.f32 %v416_v47, %v386_v0  ;;  %v473_v11 = vsel %vm323_vm1, %v471_v62, %v472_v1  ;;  %v582_v12 = vmul.f32 %v1295_v54, %v950_v63  ;;  %v583_v18 = vmul.f32 %v1295_v54, %v1303_v3  ;;  %v936_v1 = vld [vmem:[%s1241_s15 + $0x178] sm:$0x1] }
  0x26   : > { %v425_v26 = vadd.f32 %v417_v48, %v387_v6  ;;  %v584_v27 = vmul.f32 %v1295_v54, %v952_v4  ;;  %v613_v28 = vrot.slane %v581_v9, 1  ;;  %v667_v20 = vmul.f32 %v918_v31, %v1265_v24 }
  0x27   : > { %v500_v32 = vadd.f32 %v470_v7, %v424_v10  ;;  %v614_v33 = vrot.slane %v582_v12, 1  ;;  %v616_v34 = vrot.slane %v583_v18, 1  ;;  %v668_v35 = vmul.f32 %v1323_v29, %v1265_v24 }
  0x28   : > { %v501_v36 = vadd.f32 %v473_v11, %v425_v26  ;;  %v617_v37 = vrot.slane %v584_v27, 1  ;;  %v269_v39 = vmul.f32 %v1248_v14, %v1316_v19  ;;  %v270_v40 = vmul.f32 %v1248_v14, %v1319_v25 }
  0x29   : > { %v530_v41 = vadd.f32 %v522_v58, %v500_v32  ;;  %v615_v31 = vsel %vm323_vm1, %v613_v28, %v614_v33  ;;  %v299_v42 = vmul.f32 %v1250_v15, %v1316_v19  ;;  %v300_v43 = vmul.f32 %v1250_v15, %v254_v30  ;;  %v945_v28 = vld [vmem:[%s1241_s15 + $0x1f0] sm:$0xff]  ;;  %v946_v30 = vld [vmem:[%s1241_s15 + $0x200] sm:$0xff] }
  0x2a   : > { %v531_v46 = vadd.f32 %v523_v2, %v501_v36  ;;  %v618_v47 = vsel %vm323_vm1, %v616_v34, %v617_v37  ;;  %v283_v48 = vadd.f32 %v1246_v13, %v269_v39  ;;  %v284_v49 = vadd.f32 %v1246_v13, %v270_v40  ;;  %v958_v40 = vld [vmem:[%s1241_s15 + $0x58] sm:$0x1] }
  0x2b   : > { %v569_v51 = vadd.f32 %v561_v5, %v530_v41  ;;  %v301_v52 = vmul.f32 %v1250_v15, %v1319_v25  ;;  %v302_v53 = vmul.f32 %v1250_v15, %v256_v38  ;;  %v336_v55 = vrot.slane %v299_v42, 1 }
  0x2c   : > { %v570_v57 = vadd.f32 %v562_v8, %v531_v46  ;;  %v337_v58 = vrot.slane %v300_v43, 1  ;;  %v382_v59 = vmul.f32 %v1339_v44, %v1252_v16  ;;  %v383_v60 = vmul.f32 %v1342_v45, %v1252_v16  ;;  %v960_v43 = vld [vmem:[%s1241_s15 + $0x68] sm:$0x1] }
  0x2d   : > { %v645_v62 = vadd.f32 %v615_v31, %v569_v51  ;;  %v339_v63 = vrot.slane %v301_v52, 1  ;;  %v340_v0 = vrot.slane %v302_v53, 1  ;;  %v420_v2 = vmul.f32 %v933_v50, %v1254_v17 }
  0x2e   : > { %v646_v4 = vadd.f32 %v618_v47, %v570_v57  ;;  %v338_v5 = vsel %vm323_vm1, %v336_v55, %v337_v58  ;;  %v421_v6 = vmul.f32 %v935_v56, %v1254_v17  ;;  %v444_v7 = vmul.f32 %v933_v50, %v1259_v21 }
  0x2f   : > { %v675_v8 = vadd.f32 %v667_v20, %v645_v62  ;;  %v341_v9 = vsel %vm323_vm1, %v339_v63, %v340_v0  ;;  %v360_v10 = vadd.f32 %v338_v5, %v283_v48  ;;  %v445_v11 = vmul.f32 %v934_v61, %v1259_v21  ;;  %v1394_v61 = vld [vmem:[%s1241_s15 + $0x30] sm:$0xff] }
  0x30   : > { %v676_v12 = vadd.f32 %v668_v35, %v646_v4  ;;  %v361_v18 = vadd.f32 %v341_v9, %v284_v49  ;;  %v446_v26 = vmul.f32 %v935_v56, %v1259_v21  ;;  %v447_v27 = vmul.f32 %v936_v1, %v1259_v21  ;;  %v1375_v49 = vld [vmem:[%s1241_s15 + $0x60] sm:$0xff]  ;;  %v250_v1 = vld [vmem:[%s1241_s15 + $0x28] sm:$0x1] }
  0x31   : > { %v683_v32 = vmax.f32 %v675_v8, 0.0  ;;  %v390_v33 = vadd.f32 %v382_v59, %v360_v10  ;;  %v480_v34 = vrot.slane %v444_v7, 1  ;;  %v481_v20 = vrot.slane %v445_v11, 1  ;;  %v1389_v59 = vld [vmem:[%s1241_s15 + $0xf0] sm:$0xff] }
  0x32   : > { %v684_v36 = vmax.f32 %v676_v12, 0.0  ;;  %v391_v37 = vadd.f32 %v383_v60, %v361_v18  ;;  %v483_v38 = vrot.slane %v446_v26, 1  ;;  %v484_v39 = vrot.slane %v447_v27, 1  ;;  %v920_v27 = vld [vmem:[%s1241_s15 + $0xc0] sm:$0xff] }
  0x33   : > { %v428_v41 = vadd.f32 %v420_v2, %v390_v33  ;;  %v482_v35 = vsel %vm323_vm1, %v480_v34, %v481_v20  ;;  %v526_v31 = vmul.f32 %v945_v28, %v1261_v22  ;;  %v527_v42 = vmul.f32 %v946_v30, %v1261_v22  ;;  %v929_v34 = vld [vmem:[%s1241_s15 + $0x140] sm:$0xff] }
  0x34   : > { %v691_v46 = vpack.c.bf16 %v684_v36, %v683_v32  ;;  %v429_v47 = vadd.f32 %v421_v6, %v391_v37  ;;  %v485_v48 = vsel %vm323_vm1, %v483_v38, %v484_v39  ;;  %v565_v50 = vmul.f32 %v1263_v23, %v1319_v25  ;;  %v252_v6 = vld [vmem:[%s1241_s15 + $0x38] sm:$0x1] }
  0x35   : > { %v504_v51 = vadd.f32 %v482_v35, %v428_v41  ;;  %v566_v52 = vmul.f32 %v1375_v49, %v1263_v23  ;;  %v589_v53 = vmul.f32 %v1295_v54, %v1319_v25  ;;  %v590_v55 = vmul.f32 %v1295_v54, %v958_v40 }
  0x36   : > { %992 = vmatprep.mubr.msk.bf16.mxu0 %vm703_vm2, %v691_v46  ;;  %v505_v56 = vadd.f32 %v485_v48, %v429_v47  ;;  %v591_v57 = vmul.f32 %v1295_v54, %v1375_v49  ;;  %v592_v58 = vmul.f32 %v1295_v54, %v960_v43  ;;  %v671_v60 = vmul.f32 %v1342_v45, %v1265_v24  ;;  %v932_v46 = vld [vmem:[%s1241_s15 + $0x158] sm:$0x1] }
  0x37   : > { %v534_v62 = vadd.f32 %v526_v31, %v504_v51  ;;  %v625_v25 = vrot.slane %v589_v53, 1  ;;  %v626_v63 = vrot.slane %v590_v55, 1  ;;  %v672_v0 = vmul.f32 %v1389_v59, %v1265_v24  ;;  %v930_v31 = vld [vmem:[%s1241_s15 + $0x148] sm:$0x1] }
  0x38   : > { %v535_v2 = vadd.f32 %v527_v42, %v505_v56  ;;  %v628_v4 = vrot.slane %v591_v57, 1  ;;  %v629_v5 = vrot.slane %v592_v58, 1  ;;  %v267_v7 = vmul.f32 %v1303_v3, %v1248_v14 }
  0x39   : > { %v573_v45 = vadd.f32 %v565_v50, %v534_v62  ;;  %v627_v8 = vsel %vm323_vm1, %v625_v25, %v626_v63  ;;  %v268_v9 = vmul.f32 %v1248_v14, %v1394_v61  ;;  %v295_v10 = vmul.f32 %v1303_v3, %v1250_v15  ;;  %v931_v3 = vld [vmem:[%s1241_s15 + $0x150] sm:$0xff] }
  0x3a   : > { %v574_v11 = vadd.f32 %v566_v52, %v535_v2  ;;  %v630_v12 = vsel %vm323_vm1, %v628_v4, %v629_v5  ;;  %v281_v18 = vadd.f32 %v1246_v13, %v267_v7  ;;  %v296_v26 = vmul.f32 %v1250_v15, %v250_v1  ;;  %v943_v50 = vld [vmem:[%s1241_s15 + $0x1d0] sm:$0xff] }
  0x3b   : > { %v649_v28 = vadd.f32 %v627_v8, %v573_v45  ;;  %v282_v30 = vadd.f32 %v1246_v13, %v268_v9  ;;  %v297_v32 = vmul.f32 %v1250_v15, %v1394_v61  ;;  %v298_v33 = vmul.f32 %v1250_v15, %v252_v6  ;;  %v954_v6 = vld [vmem:[%s1241_s15 + $0x38] sm:$0x1]  ;;  %v956_v9 = vld [vmem:[%s1241_s15 + $0x48] sm:$0x1] }
  0x3c   : > { %v650_v20 = vadd.f32 %v630_v12, %v574_v11  ;;  %v330_v36 = vrot.slane %v295_v10, 1  ;;  %v331_v37 = vrot.slane %v296_v26, 1  ;;  %v380_v38 = vmul.f32 %v1323_v29, %v1252_v16 }
  0x3d   : > { %v679_v39 = vadd.f32 %v671_v60, %v649_v28  ;;  %v333_v40 = vrot.slane %v297_v32, 1  ;;  %v334_v41 = vrot.slane %v298_v33, 1  ;;  %v381_v35 = vmul.f32 %v920_v27, %v1252_v16  ;;  %v944_v60 = vld [vmem:[%s1241_s15 + $0x1e0] sm:$0xff] }
  0x3e   : > { %v680_v42 = vadd.f32 %v672_v0, %v650_v20  ;;  %v332_v43 = vsel %vm323_vm1, %v330_v36, %v331_v37  ;;  %v418_v47 = vmul.f32 %v929_v34, %v1254_v17  ;;  %v419_v48 = vmul.f32 %v931_v3, %v1254_v17 }
  0x3f   : > { %v687_v51 = vmax.f32 %v679_v39, 0.0  ;;  %v335_v52 = vsel %vm323_vm1, %v333_v40, %v334_v41  ;;  %v358_v29 = vadd.f32 %v332_v43, %v281_v18  ;;  %v440_v53 = vmul.f32 %v929_v34, %v1259_v21  ;;  %v1449_v34 = vld [vmem:[%s1241_s15 + $0x70] sm:$0xff] }
  0x40   : > { %v688_v55 = vmax.f32 %v680_v42, 0.0  ;;  %v359_v56 = vadd.f32 %v335_v52, %v282_v30  ;;  %v441_v57 = vmul.f32 %v930_v31, %v1259_v21  ;;  %v442_v58 = vmul.f32 %v931_v3, %v1259_v21 }
  0x41   : > { %v388_v62 = vadd.f32 %v380_v38, %v358_v29  ;;  %v443_v25 = vmul.f32 %v932_v46, %v1259_v21  ;;  %v474_v63 = vrot.slane %v440_v53, 1  ;;  %v524_v0 = vmul.f32 %v943_v50, %v1261_v22  ;;  %v258_v38 = vld [vmem:[%s1241_s15 + $0x68] sm:$0x1] }
  0x42   : > { %v693_v1 = vpack.c.bf16 %v688_v55, %v687_v51  ;;  %v389_v2 = vadd.f32 %v381_v35, %v359_v56  ;;  %v475_v4 = vrot.slane %v441_v57, 1  ;;  %v477_v5 = vrot.slane %v442_v58, 1  ;;  %v939_v57 = vld [vmem:[%s1241_s15 + $0x190] sm:$0xff] }
  0x43   : > { %v426_v7 = vadd.f32 %v418_v47, %v388_v62  ;;  %v478_v45 = vrot.slane %v443_v25, 1  ;;  %v525_v8 = vmul.f32 %v944_v60, %v1261_v22  ;;  %v563_v10 = vmul.f32 %v1263_v23, %v1394_v61 }
  0x44   : > { %996 = vmatprep.mubr.msk.bf16.mxu1 %vm703_vm2, %v693_v1  ;;  %v427_v11 = vadd.f32 %v419_v48, %v389_v2  ;;  %v476_v12 = vsel %vm323_vm1, %v474_v63, %v475_v4  ;;  %v564_v18 = vmul.f32 %v1263_v23, %v1316_v19  ;;  %v585_v26 = vmul.f32 %v1295_v54, %v1394_v61  ;;  %v938_v63 = vld [vmem:[%s1241_s15 + $0x188] sm:$0x1]  ;;  %v940_v2 = vld [vmem:[%s1241_s15 + $0x198] sm:$0x1] }
  0x45   : > { %v479_v28 = vsel %vm323_vm1, %v477_v5, %v478_v45  ;;  %v502_v30 = vadd.f32 %v476_v12, %v426_v7  ;;  %v586_v32 = vmul.f32 %v1295_v54, %v954_v6  ;;  %v587_v33 = vmul.f32 %v1295_v54, %v1316_v19  ;;  %v260_v19 = vld [vmem:[%s1241_s15 + $0x78] sm:$0x1] }
  0x46   : > { %v503_v3 = vadd.f32 %v479_v28, %v427_v11  ;;  %v588_v20 = vmul.f32 %v1295_v54, %v956_v9  ;;  %v619_v36 = vrot.slane %v585_v26, 1  ;;  %v669_v37 = vmul.f32 %v920_v27, %v1265_v24  ;;  %v948_v26 = vld [vmem:[%s1241_s15 + $0x220] sm:$0xff] }
  0x47   : > { %v532_v61 = vadd.f32 %v524_v0, %v502_v30  ;;  %v620_v39 = vrot.slane %v586_v32, 1  ;;  %v622_v40 = vrot.slane %v587_v33, 1  ;;  %v670_v41 = vmul.f32 %v1339_v44, %v1265_v24  ;;  %v1466_v44 = vld [vmem:[%s1241_s15 + $0x100] sm:$0xff]  ;;  %v962_v32 = vld [vmem:[%s1241_s15 + $0x78] sm:$0x1] }
  0x48   : > { %v533_v35 = vadd.f32 %v525_v8, %v503_v3  ;;  %v623_v31 = vrot.slane %v588_v20, 1  ;;  %v271_v42 = vmul.f32 %v1375_v49, %v1248_v14  ;;  %v272_v43 = vmul.f32 %v1248_v14, %v1449_v34  ;;  %v937_v14 = vld [vmem:[%s1241_s15 + $0x180] sm:$0xff] }
  0x49   : > { %v571_v46 = vadd.f32 %v563_v10, %v532_v61  ;;  %v621_v27 = vsel %vm323_vm1, %v619_v36, %v620_v39  ;;  %v303_v47 = vmul.f32 %v1375_v49, %v1250_v15  ;;  %v304_v48 = vmul.f32 %v1250_v15, %v258_v38  ;;  %v964_v38 = vld [vmem:[%s1241_s15 + $0x88] sm:$0x1] }
  0x4a   : > { %v572_v50 = vadd.f32 %v564_v18, %v533_v35  ;;  %v624_v51 = vsel %vm323_vm1, %v622_v40, %v623_v31  ;;  %v285_v52 = vadd.f32 %v1246_v13, %v271_v42  ;;  %v286_v29 = vadd.f32 %v1246_v13, %v272_v43  ;;  %v947_v18 = vld [vmem:[%s1241_s15 + $0x210] sm:$0xff] }
  0x4b   : > { %v647_v53 = vadd.f32 %v621_v27, %v571_v46  ;;  %v305_v55 = vmul.f32 %v1250_v15, %v1449_v34  ;;  %v306_v49 = vmul.f32 %v1250_v15, %v260_v19  ;;  %v342_v56 = vrot.slane %v303_v47, 1 }
  0x4c   : > { %v648_v58 = vadd.f32 %v624_v51, %v572_v50  ;;  %v343_v60 = vrot.slane %v304_v48, 1  ;;  %v384_v62 = vmul.f32 %v1389_v59, %v1252_v16  ;;  %v385_v25 = vmul.f32 %v1466_v44, %v1252_v16 }
  0x4d   : > { %v677_v0 = vadd.f32 %v669_v37, %v647_v53  ;;  %v345_v13 = vrot.slane %v305_v55, 1  ;;  %v346_v1 = vrot.slane %v306_v49, 1  ;;  %v422_v4 = vmul.f32 %v937_v14, %v1254_v17  ;;  %v963_v37 = vld [vmem:[%s1241_s15 + $0x80] sm:$0xff] }
  0x4e   : > { %v678_v15 = vadd.f32 %v670_v41, %v648_v58  ;;  %v344_v5 = vsel %vm323_vm1, %v342_v56, %v343_v60  ;;  %v423_v6 = vmul.f32 %v939_v57, %v1254_v17  ;;  %v448_v59 = vmul.f32 %v937_v14, %v1259_v21  ;;  %v973_v14 = vld [vmem:[%s1241_s15 + $0x110] sm:$0xff]  ;;  %s1062_s15 = scalar_lea.vmem %s1527_s11, 1024 }
  0x4f   : > { %v685_v7 = vmax.f32 %v677_v0, 0.0  ;;  %v347_v16 = vsel %vm323_vm1, %v345_v13, %v346_v1  ;;  %v362_v45 = vadd.f32 %v344_v5, %v285_v52  ;;  %v449_v8 = vmul.f32 %v938_v63, %v1259_v21  ;;  %v974_v13 = vld [vmem:[%s1581_s4] ss:$0 sm:$0xff]  ;;  %p1063_p12 = scmp.ne.s32.totalorder %s1527_s11, %s1062_s15  ;;  %p1070_p2 = scmp.lt.s32.totalorder %s1068_s24, %s1062_s15 }
  0x50   : > { %v686_v9 = vmax.f32 %v678_v15, 0.0  ;;  %v363_v10 = vadd.f32 %v347_v16, %v286_v29  ;;  %v450_v11 = vmul.f32 %v939_v57, %v1259_v21  ;;  %v451_v12 = vmul.f32 %v940_v2, %v1259_v21 }
  0x51   : > { %v392_v28 = vadd.f32 %v384_v62, %v362_v45  ;;  %v486_v17 = vrot.slane %v448_v59, 1  ;;  %v487_v30 = vrot.slane %v449_v8, 1  ;;  %v528_v40 = vmul.f32 %v947_v18, %v1261_v22  ;;  %p1064_p13 = pnand %p1063_p12, %p1215_p4  ;;  %p1071_p3 = por %p1070_p2, %p1069_p1 }
  0x52   : > { %v692_v33 = vpack.c.bf16 %v686_v9, %v685_v7  ;;  %v393_v3 = vadd.f32 %v385_v25, %v363_v10  ;;  %v489_v20 = vrot.slane %v450_v11, 1  ;;  %v490_v36 = vrot.slane %v451_v12, 1 }
  0x53   : > { %v430_v61 = vadd.f32 %v422_v4, %v392_v28  ;;  %v488_v39 = vsel %vm323_vm1, %v486_v17, %v487_v30  ;;  %v529_v41 = vmul.f32 %v948_v26, %v1261_v22  ;;  %v567_v31 = vmul.f32 %v1263_v23, %v1449_v34  ;;  %p1065_p0 = pneg %p1064_p13 }
  0x54   : > { %993 = vmatmul.mubr.msk.bf16.vlgmr.msra.gmra.mrb[0].mxu0 %vm703_vm2, %v692_v33  ;;  %v431_v21 = vadd.f32 %v423_v6, %v393_v3  ;;  %v491_v35 = vsel %vm323_vm1, %v489_v20, %v490_v36  ;;  %v593_v19 = vmul.f32 %v1295_v54, %v1449_v34  ;;  %v594_v43 = vmul.f32 %v1295_v54, %v962_v32 }
  0x55   : > { %v506_v42 = vadd.f32 %v488_v39, %v430_v61  ;;  %v595_v46 = vmul.f32 %v1295_v54, %v963_v37  ;;  %v596_v27 = vmul.f32 %v1295_v54, %v964_v38  ;;  %v568_v47 = vmul.f32 %v963_v37, %v1263_v23  ;;  %p1072_p5 = pnand %p1071_p3, %p1065_p0 }
  0x56   : > { %v507_v22 = vadd.f32 %v491_v35, %v431_v21  ;;  %v631_v48 = vrot.slane %v593_v19, 1  ;;  %v632_v51 = vrot.slane %v594_v43, 1  ;;  %v673_v54 = vmul.f32 %v1466_v44, %v1265_v24 }
  0x57   : > { %v536_v50 = vadd.f32 %v528_v40, %v506_v42  ;;  %v634_v52 = vrot.slane %v595_v46, 1  ;;  %v635_v29 = vrot.slane %v596_v27, 1  ;;  %v674_v23 = vmul.f32 %v973_v14, %v1265_v24 }
  0x58   : > { %v537_v53 = vadd.f32 %v529_v41, %v507_v22  ;;  %v633_v34 = vsel %vm323_vm1, %v631_v48, %v632_v51 }
  0x59   : > { %v575_v55 = vadd.f32 %v567_v31, %v536_v50  ;;  %v636_v49 = vsel %vm323_vm1, %v634_v52, %v635_v29 }
  0x5a   : > { %v576_v56 = vadd.f32 %v568_v47, %v537_v53 }
  0x5b   : > { %v651_v57 = vadd.f32 %v633_v34, %v575_v55 }
  0x5c   : > { %v652_v58 = vadd.f32 %v636_v49, %v576_v56 }
  0x5d   : > { %v681_v60 = vadd.f32 %v673_v54, %v651_v57 }
  0x5e   : > { %v682_v62 = vadd.f32 %v674_v23, %v652_v58 }
  0x5f   : > { %v689_v25 = vmax.f32 %v681_v60, 0.0 }
  0x60   : > { %v690_v63 = vmax.f32 %v682_v62, 0.0 }
  0x62   : > { %v694_v0 = vpack.c.bf16 %v690_v63, %v689_v25 }
  0x64   : > { %997 = vmatmul.mubr.msk.bf16.vlgmr.msra.gmra.mrb[0].mxu1 %vm703_vm2, %v694_v0 }
 0x127   : > { %v994_v44 = vpop.f32.mrb[0].mxu0 }
 0x128   : > { %v763_v1 = vadd.f32 %v994_v44, %v974_v13  ;;  %v754_v2 = vpop.f32.mrb[1].mxu0 }
 0x129   : > { %v755_v24 = vadd.f32 %v974_v13, %v754_v2  ;;  %v995_v4 = vpop.f32.mrb[2].mxu0 }
 0x12a   : > { %v787_v15 = vmax.f32 %v763_v1, 0.0  ;;  %v766_v5 = vadd.f32 %v995_v4, %v974_v13  ;;  %v757_v6 = vpop.f32.mrb[3].mxu0 }
 0x12b   : > { %v785_v59 = vmax.f32 %v755_v24, 0.0  ;;  %v758_v7 = vadd.f32 %v974_v13, %v757_v6 }
 0x12c   : > { %795 = vst [vmem:[%s231_s9 + $0x10] sm:$0xff] %v787_v15  ;;  %v788_v16 = vmax.f32 %v766_v5, 0.0 }
 0x12d   : > { %793 = vst [vmem:[%s231_s9] sm:$0xff] %v785_v59  ;;  %v786_v45 = vmax.f32 %v758_v7, 0.0 }
 0x12e   : > { %796 = vst [vmem:[%s231_s9 + $0x18] sm:$0xff] %v788_v16 }
 0x12f   : > { %794 = vst [vmem:[%s231_s9 + $0x8] sm:$0xff] %v786_v45 }
 0x137   : > { %v998_v8 = vpop.f32.mrb[0].mxu1 }
 0x138   : > { %v779_v9 = vadd.f32 %v998_v8, %v974_v13  ;;  %v770_v10 = vpop.f32.mrb[1].mxu1 }
 0x139   : > { %v771_v11 = vadd.f32 %v974_v13, %v770_v10  ;;  %v999_v12 = vpop.f32.mrb[2].mxu1 }
 0x13a   : > { %v791_v18 = vmax.f32 %v779_v9, 0.0  ;;  %v782_v26 = vadd.f32 %v999_v12, %v974_v13  ;;  %v773_v28 = vpop.f32.mrb[3].mxu1 }
 0x13b   : > { %v789_v17 = vmax.f32 %v771_v11, 0.0  ;;  %v774_v30 = vadd.f32 %v974_v13, %v773_v28 }
 0x13c   : > { %799 = vst [vmem:[%s231_s9 + $0x30] sm:$0xff] %v791_v18  ;;  %v792_v32 = vmax.f32 %v782_v26, 0.0 }
 0x13d   : > { %797 = vst [vmem:[%s231_s9 + $0x20] sm:$0xff] %v789_v17  ;;  %v790_v33 = vmax.f32 %v774_v30, 0.0 }
 0x13e   : > { %800 = vst [vmem:[%s231_s9 + $0x38] sm:$0xff] %v792_v32 }
 0x13f   : > { %798 = vst [vmem:[%s231_s9 + $0x28] sm:$0xff] %v790_v33 }
 0x140   : > { %1075 = shalt.err (!%p1072_p5)
}
 0x141   : > { %s1076_s25 = scalar_lea.hbm %s1525_s14, 1024  ;;  %s1080_s7 = scalar_lea.hbm %s1582_s5, 2048 }
 0x142   : > { %p1077_p6 = scmp.ne.s32.totalorder %s1525_s14, %s1076_s25  ;;  %p1081_p10 = scmp.lt.u32.totalorder %s1525_s14, %s1582_s5 }
 0x143   : > { %p1082_p11 = scmp.lt.u32.totalorder %s1080_s7, %s1076_s25  ;;  %p1084_p13 = scmp.lt.u32.totalorder %s1076_s25, %s1525_s14 }
 0x144   : > { %p1078_p7 = pnand %p1077_p6, %p1215_p4 }
 0x145   : > { %p1083_p12 = por %p1082_p11, %p1081_p10 }
 0x146   : > { %p1079_p9 = pneg %p1078_p7 }
 0x147   : > { %p1085_p0 = por %p1084_p13, %p1083_p12 }
 0x149   : > { %p1086_p1 = pnand %p1085_p0, %p1079_p9 }
 0x14b   : > { %1089 = shalt.err (!%p1086_p1)
}
 0x14c   : > { %s1143_s10 = smov 128   ;;  %s1144_s12 = smov 8  }
 0x14d   : > { %1005 = dma.vmem_to_hbm [thread:$0]  (%p1215_p4), %s1527_s11, 1024, %s1525_s14, %s1531_s21, %s1143_s10, %s1143_s10, %s1144_s12  }
 0x14e PF: > { %p1011_p2 = scmp.ge.s32.totalorder %s1140_s23, 2  ;;  %s832_s13 = sand.u32 1, %s1120_s18  }
 0x14f   : > { %s833_s15 = scalar_lea.sflag [#allocation3], %s832_s13 }
 0x150   : > { %p1008_p3 = pnand %p1011_p2, %p1222_p8 }
 0x152   : > { %1115 = dma.done.wait (!%p1008_p3), %s833_s15, 1024  }
 0x153   : > { %1117 = vsyncadd (!%p1008_p3), %s833_s15, 4294966272  ;;  %s18_s23 = sadd.s32 1, %s1140_s23   ;;  %s1585_s18 = smov %s1124_s19 }
 0x154   : > { %p15_p5 = scmp.ge.s32.totalorder %s18_s23, 4   ;;  %s1586_s19 = smov %s1128_s20 }
 0x155   : > { %s1587_s20 = smov %s1228_s6  ;;  %s1588_s21 = smov %s1136_s22 }
 0x156   : > { %s1589_s22 = smov %s1591_s26  ;;  %17 = sbr.rel (!%p15_p5) target bundleno = 4 (0x4), region = 81 }
 0x15d   :  { %838 = vsyncpa [#allocation3], 1 }
 0x15e   :  { %840 = vsyncpa [#allocation3 + $0x1], 1 }

</bundles_post_ra>
